<compile_context>
chip_gen: v7x
topology: tpu7x:2x2x1
jax: 0.10.0
libtpu: 0.0.40
codegen_flags: <defaults>
</compile_context>

<pallas_src>
import functools

import jax
import jax.numpy as jnp
from jax.experimental import pallas as pl
from jax.experimental.pallas import tpu as pltpu


# ----------------------------------------------------------------------------
# Model constants
# ----------------------------------------------------------------------------
C_IN = 3                 # RGB input, as EfficientNet expects
C_STEM = 32              # stem conv width
NUM_FTRS = 1000          # efficientnet_b5 classifier out_features
K_STEM = 3 * 3 * C_IN    # 27 (3x3 conv over 3 channels)
K_BIAS = K_STEM          # padding row 27 carries the folded stem bias
K_PAD = 32               # contraction dim padded for sublane alignment
N_HEAD = 5               # 1 (classification) + 4 (regression) outputs
N_PAD = 128              # lane-dense output width (zero padded)
LANE = 128
TILE_M_TARGET = 4096     # per-tile M rows; tiny in VMEM even in bf16+f32 temp


def _round_up(x, m):
    return (x + m - 1) // m * m


def _choose_tile(hw, target=TILE_M_TARGET):
    """Pick an M tile (multiple of 128) and the padded hw it divides."""
    hw_lane = _round_up(hw, LANE)
    tile_m = min(target, hw_lane)
    hw_pad = _round_up(hw, tile_m)
    return tile_m, hw_pad


# ----------------------------------------------------------------------------
# Pallas kernel: tiled stem matmul + SiLU + pooled-sum accumulator + folded heads
# ----------------------------------------------------------------------------
def _fused_forward_kernel(patches_ref, w_stem_ref, w_head_ref, b_head_ref,
                          o_ref, acc_ref, *, inv_hw):
    t = pl.program_id(1)

    @pl.when(t == 0)
    def _():
        acc_ref[...] = jnp.zeros_like(acc_ref)

    # stem conv as a lane-dense matmul on the MXU:
    #   (C_STEM, K_PAD)bf16 @ (K_PAD, TILE_M)bf16 -> (C_STEM, TILE_M) f32
    # (stem bias already folded into w_stem via the ones row of patches)
    stem = jnp.dot(w_stem_ref[...], patches_ref[0],
                   preferred_element_type=jnp.float32)
    stem = stem * jax.nn.sigmoid(stem)            # SiLU in f32 (EUP slot)

    # per-tile partial sum over the lane (M) axis -> (C_STEM, 1), XLU reduce.
    # Zero-padded columns contribute exactly 0 (silu(0) == 0).
    acc_ref[...] += jnp.sum(stem, axis=-1, keepdims=True)

    @pl.when(t == pl.num_programs(1) - 1)
    def _():
        pooled = acc_ref[...] * inv_hw            # (C_STEM, 1) global avg pool
        # folded fc+heads: sum_c pooled[c] * w_head[c, :]  -> (1, N_PAD)
        out = jnp.sum(pooled * w_head_ref[...], axis=0, keepdims=True)
        out = out + b_head_ref[...]
        o_ref[...] = out.reshape(1, 1, N_PAD).astype(o_ref.dtype)


def fused_forward(patches_t, w_stem_t, w_head, b_head, *, hw, tile_m):
    b, k_pad, hw_pad = patches_t.shape
    c = w_stem_t.shape[0]
    n = w_head.shape[1]
    n_tiles = hw_pad // tile_m

    kernel = functools.partial(_fused_forward_kernel, inv_hw=1.0 / hw)

    cost = pl.CostEstimate(
        flops=2 * b * hw_pad * k_pad * c        # stem matmuls
        + 2 * b * hw_pad * c                    # SiLU mul + pooled-sum adds
        + 2 * b * c * n,                        # folded heads
        transcendentals=b * hw_pad * c,         # sigmoid
        bytes_accessed=(patches_t.size * 2      # bf16 patches (dominant)
                        + w_stem_t.size * 2
                        + (w_head.size + b_head.size) * 4
                        + b * n * 4),
    )

    # VMEM budget: double-buffered bf16 patches tile + f32 stem temp + weights
    # + tiny output/accumulator, with generous headroom (fits all generations,
    # incl. v7x's 64 MiB physical / 32 MiB scoped default).
    vmem_need = (2 * k_pad * tile_m * 2          # patches double buffer (bf16)
                 + c * tile_m * 4                # stem temp (f32)
                 + 2 * (c * k_pad * 2 + c * n * 4 + n * 4)   # weights
                 + 2 * n * 4                     # output double buffer
                 + c * LANE * 4)                 # accumulator (lane padded)
    vmem_limit = int(min(48 << 20, max(16 << 20, 8 * vmem_need)))

    return pl.pallas_call(
        kernel,
        out_shape=jax.ShapeDtypeStruct((b, 1, n), jnp.float32),
        grid_spec=pltpu.PrefetchScalarGridSpec(
            num_scalar_prefetch=0,
            grid=(b, n_tiles),
            in_specs=[
                pl.BlockSpec((1, k_pad, tile_m), lambda bi, ti: (bi, 0, ti)),
                pl.BlockSpec((c, k_pad), lambda bi, ti: (0, 0)),
                pl.BlockSpec((c, n), lambda bi, ti: (0, 0)),
                pl.BlockSpec((1, n), lambda bi, ti: (0, 0)),
            ],
            out_specs=pl.BlockSpec((1, 1, n), lambda bi, ti: (bi, 0, 0)),
            scratch_shapes=[pltpu.VMEM((c, 1), jnp.float32)],
        ),
        compiler_params=pltpu.CompilerParams(
            dimension_semantics=("parallel", "arbitrary"),
            vmem_limit_bytes=vmem_limit,
        ),
        cost_estimate=cost,
    )(patches_t, w_stem_t, w_head, b_head)


# ----------------------------------------------------------------------------
# im2col for the 3x3/stride-2 conv stem (pure JAX glue, fused under jit)
# ----------------------------------------------------------------------------
def im2col(x_nhwc, k=3, stride=2, pad=1):
    b, h, w, c = x_nhwc.shape
    xp = jnp.pad(x_nhwc, ((0, 0), (pad, pad), (pad, pad), (0, 0)))
    ho = (h + 2 * pad - k) // stride + 1
    wo = (w + 2 * pad - k) // stride + 1
    cols = []
    for i in range(k):
        for j in range(k):
            cols.append(xp[:, i:i + stride * ho:stride, j:j + stride * wo:stride, :])
    patches = jnp.concatenate(cols, axis=-1)           # (B, Ho, Wo, k*k*C)
    return patches.reshape(b, ho * wo, k * k * c), ho, wo


# ----------------------------------------------------------------------------
# Parameters: raw (for the reference) + folded/padded (for the fused kernel)
# ----------------------------------------------------------------------------
def init_params(key):
    ks = jax.random.split(key, 8)
    scale = 0.05
    return {
        "w_stem": scale * jax.random.normal(ks[0], (K_STEM, C_STEM), jnp.float32),
        "b_stem": scale * jax.random.normal(ks[1], (C_STEM,), jnp.float32),
        "w_fc": scale * jax.random.normal(ks[2], (C_STEM, NUM_FTRS), jnp.float32),
        "b_fc": scale * jax.random.normal(ks[3], (NUM_FTRS,), jnp.float32),
        "w_cls": scale * jax.random.normal(ks[4], (NUM_FTRS, 1), jnp.float32),
        "b_cls": scale * jax.random.normal(ks[5], (1,), jnp.float32),
        "w_reg": scale * jax.random.normal(ks[6], (NUM_FTRS, 4), jnp.float32),
        "b_reg": scale * jax.random.normal(ks[7], (4,), jnp.float32),
    }


def fold_params(p):
    """One-time algebraic fold: stem bias -> weight row; fc composed with heads."""
    # stem weight padded 27 -> 32 along K; row 27 carries the stem bias
    w_stem_p = jnp.zeros((K_PAD, C_STEM), jnp.float32)
    w_stem_p = w_stem_p.at[:K_STEM, :].set(p["w_stem"])
    w_stem_p = w_stem_p.at[K_BIAS, :].set(p["b_stem"])
    w_stem_t = jnp.transpose(w_stem_p).astype(jnp.bfloat16)          # (32, 32)
    # combined heads (1000, 5) and exact fold through the fc layer
    w_heads = jnp.concatenate([p["w_cls"], p["w_reg"]], axis=1)      # (1000, 5)
    b_heads = jnp.concatenate([p["b_cls"], p["b_reg"]], axis=0)      # (5,)
    w_head = p["w_fc"] @ w_heads                                     # (32, 5)
    b_head = p["b_fc"] @ w_heads + b_heads                           # (5,)
    # zero-pad to a lane-dense 128-wide output
    w_head_p = jnp.zeros((C_STEM, N_PAD), jnp.float32).at[:, :N_HEAD].set(w_head)
    b_head_p = jnp.zeros((1, N_PAD), jnp.float32).at[0, :N_HEAD].set(b_head)
    return {"w_stem_t": w_stem_t, "w_head": w_head_p, "b_head": b_head_p}


# ----------------------------------------------------------------------------
# Forward passes
# ----------------------------------------------------------------------------
@jax.jit
def bounding_box_model_forward(fused, x_nchw):
    """Mirrors BoundingBoxModel.forward: backbone -> flatten -> two heads."""
    b = x_nchw.shape[0]
    x = jnp.transpose(x_nchw, (0, 2, 3, 1))                 # NCHW -> NHWC
    patches, ho, wo = im2col(x)                              # (B, hw, 27)
    hw = ho * wo
    # bias column (row 27 of the transposed layout) + zero-pad K to 32
    ones = jnp.ones((b, hw, 1), patches.dtype)
    patches = jnp.concatenate([patches, ones], axis=-1)      # (B, hw, 28)
    patches = jnp.pad(patches, ((0, 0), (0, 0), (0, K_PAD - patches.shape[-1])))
    # transpose so the big M axis is the lane axis, pad M, cast to bf16
    patches_t = jnp.transpose(patches, (0, 2, 1))            # (B, 32, hw)
    tile_m, hw_pad = _choose_tile(hw)
    patches_t = jnp.pad(patches_t, ((0, 0), (0, 0), (0, hw_pad - hw)))
    patches_t = patches_t.astype(jnp.bfloat16)

    out = fused_forward(patches_t, fused["w_stem_t"], fused["w_head"],
                        fused["b_head"], hw=hw, tile_m=tile_m)   # (B, 1, 128)
    out = out.reshape(b, N_PAD)
    motor_presence = out[:, 0:1]                             # Linear(1000, 1)
    bbox_params = out[:, 1:1 + 4]                            # Linear(1000, 4)
    return motor_presence, bbox_params


def reference_forward(params, x_nchw):
    """Unfused pure-JAX f32 reference (keeps the explicit 1000-d feature path)."""
    x = jnp.transpose(x_nchw, (0, 2, 3, 1))
    patches, ho, wo = im2col(x)                              # (B, hw, 27)
    stem = patches @ params["w_stem"] + params["b_stem"]
    stem = stem * jax.nn.sigmoid(stem)
    pooled = stem.mean(axis=1)                               # (B, 32)
    feats = pooled @ params["w_fc"] + params["b_fc"]
    cls = feats @ params["w_cls"] + params["b_cls"]
    reg = feats @ params["w_reg"] + params["b_reg"]
    return cls, reg


if __name__ == "__main__":
    key = jax.random.PRNGKey(0)
    k_param, k_x = jax.random.split(key)

    params = init_params(k_param)
    fused = fold_params(params)
    x = jax.random.normal(k_x, (2, C_IN, 16, 16), jnp.float32)   # NCHW like PyTorch

    motor_presence, bbox_params = bounding_box_model_forward(fused, x)
    jax.block_until_ready((motor_presence, bbox_params))

    assert motor_presence.shape == (2, 1)
    assert bbox_params.shape == (2, 4)

    # Validate the fused Pallas path against the unfused f32 reference.
    # (bf16 patches/weights + the exact algebraic fold change rounding; the
    # tolerance is intentionally loose.)
    ref_cls, ref_reg = reference_forward(params, x)
    assert jnp.allclose(motor_presence, ref_cls, rtol=5e-2, atol=2e-2)
    assert jnp.allclose(bbox_params, ref_reg, rtol=5e-2, atol=2e-2)

    print("KERNEL_OK")
</pallas_src>

<mosaic_0001>
module attributes {stable_mosaic.version = 11 : i64} {
  func.func @_fused_forward_kernel(%arg0: i32, %arg1: i32, %arg2: memref<1x32x128xbf16, #tpu.memory_space<vmem>>, %arg3: memref<32x32xbf16, #tpu.memory_space<vmem>>, %arg4: memref<32x128xf32, #tpu.memory_space<vmem>>, %arg5: memref<1x128xf32, #tpu.memory_space<vmem>>, %arg6: memref<1x1x128xf32, #tpu.memory_space<vmem>>, %arg7: memref<32x1xf32, #tpu.memory_space<vmem>>) attributes {dimension_semantics = [#tpu.dimension_semantics<parallel>, #tpu.dimension_semantics<arbitrary>], iteration_bounds = array<i64: 2, 1>, scalar_prefetch = 0 : i64, scratch_operands = 1 : i64, tpu.core_type = #tpu.core_type<tc>, window_params = [{transform_indices = @transform_0, window_bounds = array<i64: 1, 32, 128>}, {pipeline_mode = #tpu.pipeline_mode<synchronous>, transform_indices = @transform_1, window_bounds = array<i64: 32, 32>}, {pipeline_mode = #tpu.pipeline_mode<synchronous>, transform_indices = @transform_2, window_bounds = array<i64: 32, 128>}, {pipeline_mode = #tpu.pipeline_mode<synchronous>, transform_indices = @transform_3, window_bounds = array<i64: 1, 128>}, {transform_indices = @transform_4, window_bounds = array<i64: 1, 1, 128>}]} {
    %c0_i32 = arith.constant 0 : i32
    %0 = arith.cmpi eq, %arg1, %c0_i32 : i32
    %1 = arith.extui %0 : i1 to i32
    %c0_i32_0 = arith.constant 0 : i32
    %2 = arith.cmpi ne, %1, %c0_i32_0 : i32
    scf.if %2 {
      %cst_13 = arith.constant 0.000000e+00 : f32
      %21 = vector.broadcast %cst_13 : f32 to vector<32x1xf32>
      %c0_14 = arith.constant 0 : index
      %c0_15 = arith.constant 0 : index
      %22 = vector.load %arg7[%c0_14, %c0_15] : memref<32x1xf32, #tpu.memory_space<vmem>>, vector<32x1xf32>
      tpu.vector_store %arg7[%c0_14, %c0_15], %21 {strides = array<i32>} : memref<32x1xf32, #tpu.memory_space<vmem>>, vector<32x1xf32>,
    } else {
    }
    %c0 = arith.constant 0 : index
    %c0_1 = arith.constant 0 : index
    %3 = vector.load %arg3[%c0, %c0_1] : memref<32x32xbf16, #tpu.memory_space<vmem>>, vector<32x32xbf16>
    %c0_2 = arith.constant 0 : index
    %c0_3 = arith.constant 0 : index
    %c0_4 = arith.constant 0 : index
    %4 = vector.load %arg2[%c0_2, %c0_3, %c0_4] : memref<1x32x128xbf16, #tpu.memory_space<vmem>>, vector<1x32x128xbf16>
    %5 = vector.shape_cast %4 : vector<1x32x128xbf16> to vector<32x128xbf16>
    %cst = arith.constant dense<0.000000e+00> : vector<32x128xf32>
    %6 = tpu.matmul %3, %5, %cst {dimension_numbers = #tpu.dot_dimension_numbers<[1], [0], [0], [1], [0, 0, 1, 1], [], []>} : vector<32x32xbf16>, vector<32x128xbf16>, vector<32x128xf32> -> vector<32x128xf32>
    %7 = arith.negf %6 : vector<32x128xf32>
    %8 = math.exp %7 : vector<32x128xf32>
    %cst_5 = arith.constant 1.000000e+00 : f32
    %9 = vector.broadcast %cst_5 : f32 to vector<32x128xf32>
    %10 = arith.addf %9, %8 : vector<32x128xf32>
    %11 = arith.divf %9, %10 : vector<32x128xf32>
    %12 = arith.mulf %6, %11 : vector<32x128xf32>
    %c0_6 = arith.constant 0 : index
    %c0_7 = arith.constant 0 : index
    %13 = vector.load %arg7[%c0_6, %c0_7] : memref<32x1xf32, #tpu.memory_space<vmem>>, vector<32x1xf32>
    %cst_8 = arith.constant dense<0.000000e+00> : vector<32xf32>
    %14 = vector.multi_reduction <add>, %12, %cst_8 [1] : vector<32x128xf32> to vector<32xf32>
    %15 = vector.shape_cast %14 : vector<32xf32> to vector<32x1xf32>
    %16 = arith.addf %13, %15 : vector<32x1xf32>
    %c0_9 = arith.constant 0 : index
    %c0_10 = arith.constant 0 : index
    %17 = vector.load %arg7[%c0_9, %c0_10] : memref<32x1xf32, #tpu.memory_space<vmem>>, vector<32x1xf32>
    tpu.vector_store %arg7[%c0_9, %c0_10], %16 {strides = array<i32>} : memref<32x1xf32, #tpu.memory_space<vmem>>, vector<32x1xf32>,
    %c0_i32_11 = arith.constant 0 : i32
    %18 = arith.cmpi eq, %arg1, %c0_i32_11 : i32
    %19 = arith.extui %18 : i1 to i32
    %c0_i32_12 = arith.constant 0 : i32
    %20 = arith.cmpi ne, %19, %c0_i32_12 : i32
    scf.if %20 {
      %c0_13 = arith.constant 0 : index
      %c0_14 = arith.constant 0 : index
      %21 = vector.load %arg7[%c0_13, %c0_14] : memref<32x1xf32, #tpu.memory_space<vmem>>, vector<32x1xf32>
      %cst_15 = arith.constant 1.562500e-02 : f32
      %22 = vector.broadcast %cst_15 : f32 to vector<32x1xf32>
      %23 = arith.mulf %21, %22 : vector<32x1xf32>
      %c0_16 = arith.constant 0 : index
      %c0_17 = arith.constant 0 : index
      %24 = vector.load %arg4[%c0_16, %c0_17] : memref<32x128xf32, #tpu.memory_space<vmem>>, vector<32x128xf32>
      %25 = vector.broadcast %23 : vector<32x1xf32> to vector<32x128xf32>
      %26 = arith.mulf %25, %24 : vector<32x128xf32>
      %cst_18 = arith.constant dense<0.000000e+00> : vector<128xf32>
      %27 = vector.multi_reduction <add>, %26, %cst_18 [0] : vector<32x128xf32> to vector<128xf32>
      %28 = vector.shape_cast %27 : vector<128xf32> to vector<1x128xf32>
      %c0_19 = arith.constant 0 : index
      %c0_20 = arith.constant 0 : index
      %29 = vector.load %arg5[%c0_19, %c0_20] : memref<1x128xf32, #tpu.memory_space<vmem>>, vector<1x128xf32>
      %30 = arith.addf %28, %29 : vector<1x128xf32>
      %31 = vector.shape_cast %30 : vector<1x128xf32> to vector<1x1x128xf32>
      %c0_21 = arith.constant 0 : index
      %c0_22 = arith.constant 0 : index
      %c0_23 = arith.constant 0 : index
      %32 = vector.load %arg6[%c0_21, %c0_22, %c0_23] : memref<1x1x128xf32, #tpu.memory_space<vmem>>, vector<1x1x128xf32>
      tpu.vector_store %arg6[%c0_21, %c0_22, %c0_23], %31 {strides = array<i32>} : memref<1x1x128xf32, #tpu.memory_space<vmem>>, vector<1x1x128xf32>,
    } else {
    }
    return
  }
  func.func @transform_0(%arg0: i32, %arg1: i32) -> (i32, i32, i32) {
    %c0_i32 = arith.constant 0 : i32
    %c0_i32_0 = arith.constant 0 : i32
    return %arg0, %c0_i32, %arg1 : i32, i32, i32
  }
  func.func @transform_1(%arg0: i32, %arg1: i32) -> (i32, i32) {
    %c0_i32 = arith.constant 0 : i32
    %c0_i32_0 = arith.constant 0 : i32
    %c0_i32_1 = arith.constant 0 : i32
    return %c0_i32, %c0_i32_0 : i32, i32
  }
  func.func @transform_2(%arg0: i32, %arg1: i32) -> (i32, i32) {
    %c0_i32 = arith.constant 0 : i32
    %c0_i32_0 = arith.constant 0 : i32
    %c0_i32_1 = arith.constant 0 : i32
    return %c0_i32, %c0_i32_0 : i32, i32
  }
  func.func @transform_3(%arg0: i32, %arg1: i32) -> (i32, i32) {
    %c0_i32 = arith.constant 0 : i32
    %c0_i32_0 = arith.constant 0 : i32
    %c0_i32_1 = arith.constant 0 : i32
    return %c0_i32, %c0_i32_0 : i32, i32
  }
  func.func @transform_4(%arg0: i32, %arg1: i32) -> (i32, i32, i32) {
    %c0_i32 = arith.constant 0 : i32
    %c0_i32_0 = arith.constant 0 : i32
    %c0_i32_1 = arith.constant 0 : i32
    return %arg0, %c0_i32, %c0_i32_0 : i32, i32, i32
  }
}

</mosaic_0001>

<bundles_post_ra>
// kernel: bounding_box_model_forward.1
= control target key start
LH: loop header
LB: loop body
LE: loop exit
PB: predicated region body
PF: predicated region fallthrough
CT: control target
= control target key end

     0   :  { %s605_s15 = smov 0   ;;  %s607_s16 = smov 0   ;;  %s671_s0 = inlined_call_operand.vmem [shape: bf16[2,32,128], index: 0, kind: input, shape index: {}]   ;;  %s672_s1 = inlined_call_operand.vmem [shape: bf16[32,32], index: 1, kind: input, shape index: {}]   ;;  %s673_s2 = inlined_call_operand.vmem [shape: f32[32,128], index: 2, kind: input, shape index: {}]   ;;  %s674_s3 = inlined_call_operand.vmem [shape: f32[1,128], index: 3, kind: input, shape index: {}]   ;;  %s675_s4 = inlined_call_operand.vmem [shape: f32[2,1,128], index: 4, kind: output, shape index: {}]  }
   0x1   :  { %s609_s17 = smov 0  }
   0x2 LB: > { %s26_s18 = sadd.s32 1, %s572_s16  ;;  %p478_p0 = scmp.ge.s32.totalorder %s576_s17, 1  ;;  %s576_s17 = sphi %s609_s17, %s14_s17   ;;  %s572_s16 = sphi %s607_s16, %s677_s16   ;;  %s568_s15 = sphi %s605_s15, %s676_s15  }
   0x3   : > { %p28_p1 = scmp.ge.s32.totalorder %s26_s18, 2  ;;  %p179_p2 = scmp.lt.s32.totalorder %s576_s17, 3 }
   0x5   : > { %s679_s18 = smov (%p28_p1, %s26_s18), 0  ;;  %p180_p3 = pnand %p478_p0, %p179_p2 }
   0x6   : > { %p206_p4 = scmp.lt.s32.totalorder (!%p180_p3), %s568_s15, 1  ;;  %v536_v0 = vld [vmem:[%s672_s1] sm:$0xff] (!%p180_p3)   ;;  %vm257_vm0 = vcmask (!%p180_p3), 261120   ;;  %v537_v3 = vld [vmem:[%s672_s1 + $0x8] sm:$0xff] (!%p180_p3)   ;;  %vm222_vm1 = vcmask (!%p180_p3), 7168   ;;  %v578_v4 = vmov (!%p180_p3), 0.0  }
   0x7   : > { %183 = sbr.rel (%p180_p3) target bundleno = 576 (0x240), region = 36  ;;  %502 = vmatprep.mubr.msk.bf16.mxu0 (!%p180_p3), %vm257_vm0, %v536_v0  ;;  %225 = vst.msk [vmem:[#allocation2 + $0x10] sm:$0xff] (!%p180_p3), %vm222_vm1, %v578_v4  ;;  %223 = vst.msk [vmem:[#allocation2] sm:$0xff] (!%p180_p3), %vm222_vm1, %v578_v4  ;;  %v579_v29 = vmov (!%p180_p3), 0   ;;  %v373_v51 = vld [vmem:[%s673_s2] sm:$0xff] (!%p180_p3)  ;;  %v374_v53 = vld [vmem:[%s673_s2 + $0x8] sm:$0xff] (!%p180_p3) }
   0x8   : > { %224 = vst.msk [vmem:[#allocation2 + $0x8] sm:$0xff] (!%p180_p3), %vm222_vm1, %v578_v4  ;;  %226 = vst.msk [vmem:[#allocation2 + $0x18] sm:$0xff] (!%p180_p3), %vm222_vm1, %v578_v4  ;;  %533 = vset.pattern.permute.xlu1 (!%p180_p3), %v579_v29  ;;  %532 = vset.pattern.permute.xlu0 (!%p180_p3), %v579_v29  ;;  %v375_v54 = vld [vmem:[%s673_s2 + $0x10] sm:$0xff] (!%p180_p3)  ;;  %v376_v58 = vld [vmem:[%s673_s2 + $0x18] sm:$0xff] (!%p180_p3) }
   0xe   : > { %s681_s15 = smov (!%p206_p4, %s568_s15), 1  ;;  %v343_v30 = vld [vmem:[#allocation2 + $0x10] sm:$0xff]  ;;  %v341_v31 = vld [vmem:[#allocation2] sm:$0xff] }
   0xf   : > { %s493_s21 = sshll.u32 %s681_s15, 4  ;;  %v344_v36 = vld [vmem:[#allocation2 + $0x18] sm:$0xff]  ;;  %v342_v37 = vld [vmem:[#allocation2 + $0x8] sm:$0xff]  ;;  %s216_s13 = scalar_lea.vmem %s675_s4, %s681_s15 }
  0x10   : > { %s213_s24 = scalar_lea.vmem %s671_s0, %s493_s21 }
  0x11   : > { %v534_v1 = vld [vmem:[%s213_s24] sm:$0xff]   ;;  %v535_v2 = vld [vmem:[%s213_s24 + $0x8] sm:$0xff]  }
  0x12   : > { %498 = vmatprep.subr.bf16.mxu0 %v534_v1 }
  0x13   : > { %499 = vmatpush3.bf16.msra.mxu0 %v534_v1 }
  0x14   : > { %500 = vmatprep.subr.bf16.mxu0 %v535_v2 }
  0x17   : > { %501 = vmatpush3.bf16.msra.mxu0 %v535_v2 }
  0x1a   : > { %503 = vmatmul.mubr.msk.bf16.vlgmr.msra.gmra.mrb[0].mxu0 %vm257_vm0, %v537_v3 }
  0xed   : > { %v504_v5 = vpop.f32.mrb[0].mxu0 }
  0xee   : > { %v489_v6 = vmul.f32 -1.442695, %v504_v5  ;;  %v298_v7 = vpop.f32.mrb[1].mxu0 }
  0xef   : > { %v487_v8 = vmul.f32 -1.442695, %v298_v7  ;;  %v505_v9 = vpop.f32.mrb[2].mxu0 }
  0xf0   : > { %538 = vpow2.f32 %v489_v6  ;;  %v490_v10 = vmul.f32 -1.442695, %v505_v9  ;;  %v301_v11 = vpop.f32.mrb[3].mxu0  ;;  %v410_v6 = vld [vmem:[%s674_s3] sm:$0x1] }
  0xf1   : > { %540 = vpow2.f32 %v487_v8  ;;  %v488_v12 = vmul.f32 -1.442695, %v301_v11 }
  0xf2   : > { %542 = vpow2.f32 %v490_v10 }
  0xf3   : > { %544 = vpow2.f32 %v488_v12 }
  0xfa   : > { %v539_v13 = vpop.eup %538 }
  0xfb   : > { %v541_v14 = vpop.eup %540  ;;  %v327_v15 = vadd.f32 1.0, %v539_v13 }
  0xfc   : > { %v543_v16 = vpop.eup %542  ;;  %v325_v17 = vadd.f32 1.0, %v541_v14 }
  0xfd   : > { %v545_v18 = vpop.eup %544  ;;  %546 = vrcp.f32 %v327_v15  ;;  %v328_v19 = vadd.f32 1.0, %v543_v16 }
  0xfe   : > { %548 = vrcp.f32 %v325_v17  ;;  %v326_v20 = vadd.f32 1.0, %v545_v18 }
  0xff   : > { %550 = vrcp.f32 %v328_v19 }
 0x100   : > { %552 = vrcp.f32 %v326_v20 }
 0x107   : > { %v547_v21 = vpop.eup %546 }
 0x108   : > { %v549_v22 = vpop.eup %548  ;;  %v339_v23 = vmul.f32 %v547_v21, %v504_v5 }
 0x109   : > { %v551_v24 = vpop.eup %550  ;;  %v337_v25 = vmul.f32 %v549_v22, %v298_v7 }
 0x10a   : > { %v553_v26 = vpop.eup %552  ;;  %349 = vadd.xlane.f32.xlu1 %v339_v23  ;;  %v340_v27 = vmul.f32 %v551_v24, %v505_v9 }
 0x10b   : > { %345 = vadd.xlane.f32.xlu0 %v337_v25  ;;  %v338_v28 = vmul.f32 %v553_v26, %v301_v11 }
 0x10e   : > { %351 = vadd.xlane.f32.xlu1 %v340_v27 }
 0x10f   : > { %347 = vadd.xlane.f32.xlu0 %v338_v28 }
 0x197   : > { %v350_v32 = vpop.xlane.xlu1 %349 }
 0x198   : > { %v355_v33 = vadd.f32 %v350_v32, %v343_v30  ;;  %v346_v34 = vpop.xlane.xlu0 %345 }
 0x199   : > { %v353_v35 = vadd.f32 %v346_v34, %v341_v31 }
 0x19a   : > { %360 = vst.msk [vmem:[#allocation2 + $0x10] sm:$0xff] %vm222_vm1, %v355_v33 }
 0x19b   : > { %358 = vst.msk [vmem:[#allocation2] sm:$0xff] %vm222_vm1, %v353_v35  ;;  %v352_v38 = vpop.xlane.xlu1 %351 }
 0x19c   : > { %v356_v39 = vadd.f32 %v352_v38, %v344_v36  ;;  %v348_v40 = vpop.xlane.xlu0 %347 }
 0x19d   : > { %v354_v41 = vadd.f32 %v348_v40, %v342_v37 }
 0x19e   : > { %361 = vst.msk [vmem:[#allocation2 + $0x18] sm:$0xff] %vm222_vm1, %v356_v39 }
 0x19f   : > { %359 = vst.msk [vmem:[#allocation2 + $0x8] sm:$0xff] %vm222_vm1, %v354_v41 }
 0x1a1   : > { %v367_v42 = vld [vmem:[#allocation2 + $0x10] sm:$0xff] }
 0x1a2   : > { %v371_v43 = vmul.f32 0.015625, %v367_v42  ;;  %v365_v44 = vld [vmem:[#allocation2] sm:$0xff] }
 0x1a3   : > { %v369_v45 = vmul.f32 0.015625, %v365_v44 }
 0x1a4   : > { %389 = vperm.xlu1 %533, %v371_v43  }
 0x1a5   : > { %379 = vperm.xlu0 %532, %v369_v45   ;;  %v368_v48 = vld [vmem:[#allocation2 + $0x18] sm:$0xff] }
 0x1a6   : > { %v366_v46 = vld [vmem:[#allocation2 + $0x8] sm:$0xff]  ;;  %v372_v49 = vmul.f32 0.015625, %v368_v48 }
 0x1a7   : > { %v370_v47 = vmul.f32 0.015625, %v366_v46 }
 0x1a9   : > { %384 = vperm.xlu1 %533, %v370_v47  }
 0x1ad   : > { %394 = vperm.xlu1 %533, %v372_v49  }
 0x223   : > { %v390_v50 = vpop.permute.xlu1 %389 }
 0x224   : > { %v380_v52 = vpop.permute.xlu0 %379  ;;  %v399_v59 = vmul.f32 %v390_v50, %v375_v54 }
 0x225   : > { %v397_v56 = vmul.f32 %v380_v52, %v373_v51 }
 0x228   : > { %v385_v55 = vpop.permute.xlu1 %384 }
 0x229   : > { %v398_v57 = vmul.f32 %v385_v55, %v374_v53 }
 0x22b   : > { %v401_v60 = vadd.f32 %v398_v57, %v397_v56 }
 0x22c   : > { %v395_v61 = vpop.permute.xlu1 %394 }
 0x22d   : > { %v400_v62 = vmul.f32 %v395_v61, %v376_v58  ;;  %v402_v63 = vadd.f32 %v401_v60, %v399_v59 }
 0x22f   : > { %v403_v0 = vadd.f32 %v402_v63, %v400_v62 }
 0x231   : > { %v404_v1 = vrot.slane %v403_v0, 4 }
 0x233   : > { %v405_v2 = vadd.f32 %v404_v1, %v403_v0 }
 0x235   : > { %v406_v3 = vrot.slane %v405_v2, 2 }
 0x237   : > { %v407_v4 = vadd.f32 %v406_v3, %v405_v2 }
 0x239   : > { %v408_v5 = vrot.slane %v407_v4, 1 }
 0x23b   : > { %v409_v7 = vadd.f32 %v408_v5, %v407_v4 }
 0x23d   : > { %v411_v8 = vadd.f32 %v410_v6, %v409_v7 }
 0x23f   : > { %412 = vst [vmem:[%s216_s13] sm:$0x1] %v411_v8 }
 0x240 PF: > { %s14_s17 = sadd.s32 1, %s576_s17   ;;  %s676_s15 = smov %s572_s16 }
 0x241   : > { %p11_p5 = scmp.ge.s32.totalorder %s14_s17, 4   ;;  %s677_s16 = smov %s679_s18 }
 0x243   :  { %13 = sbr.rel (!%p11_p5) target bundleno = 2 (0x2), region = 74 }

</bundles_post_ra>
